<compile_context>
chip_gen: v6e
topology: v6e:2x2x1
jax: 0.10.0
libtpu: 0.0.40
codegen_flags: <defaults>
</compile_context>

<pallas_src>
import functools

import jax
import jax.numpy as jnp
from jax.experimental import pallas as pl
from jax.experimental.pallas import tpu as pltpu


_LANE = 128
_TILE_ROWS_TARGET = 512          # 512 rows x 128 lanes = 65536 elems per channel per step
_X_TILE_BUDGET_BYTES = 2 << 20   # cap per-buffer x tile (C * tile_rows * 128 * 4B) at ~2 MiB
_CHUNK_ROWS = 32                 # rows per in-kernel chunk (bounds live vregs)


def _depthnet_body(x_ref, pm_ref, w_ref, b_ref, o_ref, *, C, O, has_pm):
    # x_ref : (C, R, 128)  VMEM, input channels
    # pm_ref: (1, R, 128)  VMEM, potential map tile (only if has_pm)
    # w_ref : (O, Cp)      SMEM  (Cp = C + 1 if has_pm else C)
    # b_ref : (O,)         SMEM
    # o_ref : (O, R, 128)  VMEM
    R = x_ref.shape[1]
    r0 = 0
    while r0 < R:                                    # static chunk loop (R is static)
        rc = min(_CHUNK_ROWS, R - r0)
        xs = [x_ref[c, r0:r0 + rc, :].astype(jnp.float32) for c in range(C)]
        pm = pm_ref[0, r0:r0 + rc, :].astype(jnp.float32) if has_pm else None
        for o in range(O):                           # O is tiny & static
            acc = w_ref[o, 0] * xs[0] + b_ref[o]     # fused init: first channel + bias
            for c in range(1, C):                    # VPU weighted row-sum (no MXU needed)
                acc = acc + w_ref[o, c] * xs[c]
            if has_pm:
                acc = acc + w_ref[o, C] * pm         # potential-map channel folded in
            o_ref[o, r0:r0 + rc, :] = jnp.maximum(acc, 0.0).astype(o_ref.dtype)
        r0 += rc


def _make_kernel(C, O, has_pm):
    body = functools.partial(_depthnet_body, C=C, O=O, has_pm=has_pm)
    if has_pm:
        def kernel(x_ref, pm_ref, w_ref, b_ref, o_ref):
            body(x_ref, pm_ref, w_ref, b_ref, o_ref)
    else:
        def kernel(x_ref, w_ref, b_ref, o_ref):
            body(x_ref, None, w_ref, b_ref, o_ref)
    return kernel


def depthnet_forward(x, potential_map, conv_w, conv_b):
    """x: (B, C, H, W) f32 NCHW. potential_map: (1, H, W) or None.
    conv_w: (O, Cin) with Cin = C (+1 if potential_map is not None). conv_b: (O,).
    Returns relu(1x1-conv([x, pm])) of shape (B, O, H, W)."""
    B, C, H, W = x.shape
    O = conv_w.shape[0]
    has_pm = potential_map is not None
    Cp = C + (1 if has_pm else 0)
    assert conv_w.shape == (O, Cp)
    HW = H * W

    # Lane/sublane-dense layout: HW -> (rows, 128). Free reshape when HW % 128 == 0
    # (the common case); otherwise pad only to the next multiple of 128.
    hw128 = -(-HW // _LANE) * _LANE
    rows = hw128 // _LANE

    x_flat = x.reshape(B, C, HW)
    pm_flat = potential_map.reshape(1, HW) if has_pm else None
    if hw128 != HW:
        x_flat = jnp.pad(x_flat, ((0, 0), (0, 0), (0, hw128 - HW)))
        if has_pm:
            pm_flat = jnp.pad(pm_flat, ((0, 0), (0, hw128 - HW)))
    x_r = x_flat.reshape(B, C, rows, _LANE)
    pm_r = pm_flat.reshape(1, rows, _LANE) if has_pm else None

    # Tile rows: as big as possible (amortize per-step overhead) while keeping the
    # double-buffered x tile at a couple of MiB (safe even for v5e's 16 MiB scoped VMEM).
    rows_budget = max(8, (_X_TILE_BUDGET_BYTES // (C * _LANE * 4)) // 8 * 8)
    tile_rows = min(_TILE_ROWS_TARGET, rows_budget)
    if rows <= tile_rows:
        tile_rows = rows                 # full-extent block (allowed even if not %8)
    n_hw = pl.cdiv(rows, tile_rows)      # ragged last block handled by Pallas masking

    kernel = _make_kernel(C, O, has_pm)
    smem_spec = pl.BlockSpec(memory_space=pltpu.MemorySpace.SMEM)

    # Grid = (hw_tiles, batch): pm's block index depends only on the OUTER axis, so the
    # potential map is DMA'd once per hw tile (one full HBM read in total, not B reads).
    in_specs = [pl.BlockSpec((None, C, tile_rows, _LANE), lambda j, b: (b, 0, j, 0))]
    operands = [x_r]
    if has_pm:
        in_specs.append(pl.BlockSpec((1, tile_rows, _LANE), lambda j, b: (0, j, 0)))
        operands.append(pm_r)
    in_specs += [smem_spec, smem_spec]
    operands += [conv_w, conv_b]

    out_r = pl.pallas_call(
        kernel,
        out_shape=jax.ShapeDtypeStruct((B, O, rows, _LANE), x.dtype),
        grid_spec=pltpu.PrefetchScalarGridSpec(
            num_scalar_prefetch=0,
            grid=(n_hw, B),
            in_specs=in_specs,
            out_specs=pl.BlockSpec((None, O, tile_rows, _LANE), lambda j, b: (b, 0, j, 0)),
        ),
        compiler_params=pltpu.CompilerParams(
            dimension_semantics=("parallel", "parallel"),
        ),
    )(*operands)

    out_flat = out_r.reshape(B, O, hw128)
    if hw128 != HW:
        out_flat = out_flat[:, :, :HW]
    return out_flat.reshape(B, O, H, W)


def _reference_forward(x, potential_map, conv_w, conv_b):
    B, C, H, W = x.shape
    if potential_map is not None:
        pm = jnp.broadcast_to(potential_map[None, :, :, :], (B, 1, H, W))
        x = jnp.concatenate([x, pm], axis=1)
    y = jnp.einsum("oc,bchw->bohw", conv_w, x) + conv_b[None, :, None, None]
    return jnp.maximum(y, 0.0)


if __name__ == "__main__":
    # Small shapes consistent with the module: batch=2, in_channels=4, spatial=16x16,
    # fixed_height=fixed_width=16, out_channels=1.
    B, C, H, W = 2, 4, 16, 16
    OUT_CH = 1

    key = jax.random.PRNGKey(0)
    k_x, k_pm, k_w, k_b = jax.random.split(key, 4)

    x = jax.random.normal(k_x, (B, C, H, W), dtype=jnp.float32)

    # Deterministic synthetic params (torch.Tensor(1,H,W) is uninitialized, so any
    # deterministic init is acceptable); conv weight is (O, C+1, 1, 1) squeezed to (O, C+1).
    potential_map = jax.random.normal(k_pm, (1, H, W), dtype=jnp.float32)
    conv_w = jax.random.normal(k_w, (OUT_CH, C + 1), dtype=jnp.float32) * 0.1
    conv_b = jax.random.normal(k_b, (OUT_CH,), dtype=jnp.float32) * 0.1

    out = depthnet_forward(x, potential_map, conv_w, conv_b)
    out = jax.block_until_ready(out)

    ref = _reference_forward(x, potential_map, conv_w, conv_b)
    assert out.shape == (B, OUT_CH, H, W), out.shape
    assert jnp.allclose(out, ref, atol=1e-5, rtol=1e-5), "mismatch vs reference"

    # Also exercise the no-potential-map branch of the module.
    conv_w2 = jax.random.normal(k_w, (OUT_CH, C), dtype=jnp.float32) * 0.1
    out2 = jax.block_until_ready(depthnet_forward(x, None, conv_w2, conv_b))
    ref2 = _reference_forward(x, None, conv_w2, conv_b)
    assert jnp.allclose(out2, ref2, atol=1e-5, rtol=1e-5), "mismatch vs reference (no pm)"

    print("KERNEL_OK")
</pallas_src>

<mosaic_0001>
module attributes {stable_mosaic.version = 11 : i64} {
  func.func @kernel(%arg0: i32, %arg1: i32, %arg2: memref<1x4x2x128xf32, #tpu.memory_space<vmem>>, %arg3: memref<1x2x128xf32, #tpu.memory_space<vmem>>, %arg4: memref<1x5xf32, #tpu.memory_space<smem>>, %arg5: memref<1xf32, #tpu.memory_space<smem>>, %arg6: memref<1x1x2x128xf32, #tpu.memory_space<vmem>>) attributes {dimension_semantics = [#tpu.dimension_semantics<parallel>, #tpu.dimension_semantics<parallel>], iteration_bounds = array<i64: 1, 2>, scalar_prefetch = 0 : i64, scratch_operands = 0 : i64, tpu.core_type = #tpu.core_type<tc>, window_params = [{transform_indices = @transform_0, window_bounds = array<i64: 1, 4, 2, 128>}, {transform_indices = @transform_1, window_bounds = array<i64: 1, 2, 128>}, {transform_indices = @transform_2, window_bounds = array<i64: 1, 5>}, {transform_indices = @transform_3, window_bounds = array<i64: 1>}, {transform_indices = @transform_4, window_bounds = array<i64: 1, 1, 2, 128>}]} {
    %c0 = arith.constant 0 : index
    %c0_0 = arith.constant 0 : index
    %c0_1 = arith.constant 0 : index
    %c0_2 = arith.constant 0 : index
    %0 = vector.load %arg2[%c0, %c0_0, %c0_1, %c0_2] : memref<1x4x2x128xf32, #tpu.memory_space<vmem>>, vector<1x1x2x128xf32>
    %1 = vector.shape_cast %0 : vector<1x1x2x128xf32> to vector<2x128xf32>
    %c0_3 = arith.constant 0 : index
    %c1 = arith.constant 1 : index
    %c0_4 = arith.constant 0 : index
    %c0_5 = arith.constant 0 : index
    %2 = vector.load %arg2[%c0_3, %c1, %c0_4, %c0_5] : memref<1x4x2x128xf32, #tpu.memory_space<vmem>>, vector<1x1x2x128xf32>
    %3 = vector.shape_cast %2 : vector<1x1x2x128xf32> to vector<2x128xf32>
    %c0_6 = arith.constant 0 : index
    %c2 = arith.constant 2 : index
    %c0_7 = arith.constant 0 : index
    %c0_8 = arith.constant 0 : index
    %4 = vector.load %arg2[%c0_6, %c2, %c0_7, %c0_8] : memref<1x4x2x128xf32, #tpu.memory_space<vmem>>, vector<1x1x2x128xf32>
    %5 = vector.shape_cast %4 : vector<1x1x2x128xf32> to vector<2x128xf32>
    %c0_9 = arith.constant 0 : index
    %c3 = arith.constant 3 : index
    %c0_10 = arith.constant 0 : index
    %c0_11 = arith.constant 0 : index
    %6 = vector.load %arg2[%c0_9, %c3, %c0_10, %c0_11] : memref<1x4x2x128xf32, #tpu.memory_space<vmem>>, vector<1x1x2x128xf32>
    %7 = vector.shape_cast %6 : vector<1x1x2x128xf32> to vector<2x128xf32>
    %c0_12 = arith.constant 0 : index
    %c0_13 = arith.constant 0 : index
    %c0_14 = arith.constant 0 : index
    %8 = vector.load %arg3[%c0_12, %c0_13, %c0_14] : memref<1x2x128xf32, #tpu.memory_space<vmem>>, vector<1x2x128xf32>
    %9 = vector.shape_cast %8 : vector<1x2x128xf32> to vector<2x128xf32>
    %c0_15 = arith.constant 0 : index
    %c0_16 = arith.constant 0 : index
    %10 = memref.load %arg4[%c0_15, %c0_16] : memref<1x5xf32, #tpu.memory_space<smem>>
    %11 = vector.broadcast %10 : f32 to vector<2x128xf32>
    %12 = arith.mulf %11, %1 : vector<2x128xf32>
    %c0_17 = arith.constant 0 : index
    %13 = memref.load %arg5[%c0_17] : memref<1xf32, #tpu.memory_space<smem>>
    %14 = vector.broadcast %13 : f32 to vector<2x128xf32>
    %15 = arith.addf %12, %14 : vector<2x128xf32>
    %c0_18 = arith.constant 0 : index
    %c1_19 = arith.constant 1 : index
    %16 = memref.load %arg4[%c0_18, %c1_19] : memref<1x5xf32, #tpu.memory_space<smem>>
    %17 = vector.broadcast %16 : f32 to vector<2x128xf32>
    %18 = arith.mulf %17, %3 : vector<2x128xf32>
    %19 = arith.addf %15, %18 : vector<2x128xf32>
    %c0_20 = arith.constant 0 : index
    %c2_21 = arith.constant 2 : index
    %20 = memref.load %arg4[%c0_20, %c2_21] : memref<1x5xf32, #tpu.memory_space<smem>>
    %21 = vector.broadcast %20 : f32 to vector<2x128xf32>
    %22 = arith.mulf %21, %5 : vector<2x128xf32>
    %23 = arith.addf %19, %22 : vector<2x128xf32>
    %c0_22 = arith.constant 0 : index
    %c3_23 = arith.constant 3 : index
    %24 = memref.load %arg4[%c0_22, %c3_23] : memref<1x5xf32, #tpu.memory_space<smem>>
    %25 = vector.broadcast %24 : f32 to vector<2x128xf32>
    %26 = arith.mulf %25, %7 : vector<2x128xf32>
    %27 = arith.addf %23, %26 : vector<2x128xf32>
    %c0_24 = arith.constant 0 : index
    %c4 = arith.constant 4 : index
    %28 = memref.load %arg4[%c0_24, %c4] : memref<1x5xf32, #tpu.memory_space<smem>>
    %29 = vector.broadcast %28 : f32 to vector<2x128xf32>
    %30 = arith.mulf %29, %9 : vector<2x128xf32>
    %31 = arith.addf %27, %30 : vector<2x128xf32>
    %cst = arith.constant 0.000000e+00 : f32
    %32 = vector.broadcast %cst : f32 to vector<2x128xf32>
    %33 = arith.maximumf %31, %32 : vector<2x128xf32>
    %c0_25 = arith.constant 0 : index
    %c0_26 = arith.constant 0 : index
    %c0_27 = arith.constant 0 : index
    %c0_28 = arith.constant 0 : index
    %34 = vector.load %arg6[%c0_25, %c0_26, %c0_27, %c0_28] : memref<1x1x2x128xf32, #tpu.memory_space<vmem>>, vector<1x1x2x128xf32>
    %35 = vector.shape_cast %34 : vector<1x1x2x128xf32> to vector<2x128xf32>
    %36 = vector.shape_cast %33 : vector<2x128xf32> to vector<1x1x2x128xf32>
    tpu.vector_store %arg6[%c0_25, %c0_26, %c0_27, %c0_28], %36 {strides = array<i32>} : memref<1x1x2x128xf32, #tpu.memory_space<vmem>>, vector<1x1x2x128xf32>,
    return
  }
  func.func @transform_0(%arg0: i32, %arg1: i32) -> (i32, i32, i32, i32) {
    %c0_i32 = arith.constant 0 : i32
    %c0_i32_0 = arith.constant 0 : i32
    %c0_i32_1 = arith.constant 0 : i32
    return %arg1, %c0_i32, %arg0, %c0_i32_0 : i32, i32, i32, i32
  }
  func.func @transform_1(%arg0: i32, %arg1: i32) -> (i32, i32, i32) {
    %c0_i32 = arith.constant 0 : i32
    %c0_i32_0 = arith.constant 0 : i32
    %c0_i32_1 = arith.constant 0 : i32
    return %c0_i32, %arg0, %c0_i32_0 : i32, i32, i32
  }
  func.func @transform_2(%arg0: i32, %arg1: i32) -> (i32, i32) {
    %c0_i32 = arith.constant 0 : i32
    %c0_i32_0 = arith.constant 0 : i32
    %c0_i32_1 = arith.constant 0 : i32
    return %c0_i32, %c0_i32_0 : i32, i32
  }
  func.func @transform_3(%arg0: i32, %arg1: i32) -> i32 {
    %c0_i32 = arith.constant 0 : i32
    %c0_i32_0 = arith.constant 0 : i32
    return %c0_i32 : i32
  }
  func.func @transform_4(%arg0: i32, %arg1: i32) -> (i32, i32, i32, i32) {
    %c0_i32 = arith.constant 0 : i32
    %c0_i32_0 = arith.constant 0 : i32
    %c0_i32_1 = arith.constant 0 : i32
    return %arg1, %c0_i32, %arg0, %c0_i32_0 : i32, i32, i32, i32
  }
}

</mosaic_0001>

<bundles_post_ra>
// kernel: tpu_custom_call.1
= control target key start
LH: loop header
LB: loop body
LE: loop exit
PB: predicated region body
PF: predicated region fallthrough
CT: control target
= control target key end

     0   :  { %s855_s0 = inlined_call_operand.hbm [shape: f32[2,4,2,128], index: 0, kind: input, shape index: {}]   ;;  %s856_s1 = inlined_call_operand.vmem [shape: f32[1,2,128], index: 1, kind: input, shape index: {}]   ;;  %s857_s2 = inlined_call_operand.vmem [shape: f32[1,5], index: 2, kind: input, shape index: {}]   ;;  %s858_s3 = inlined_call_operand.<no memory space> [shape: f32[1], index: 3, kind: input, shape index: {}]   ;;  %s859_s4 = inlined_call_operand.hbm [shape: f32[2,1,2,128], index: 4, kind: output, shape index: {}]  }
   0x1   :  { %861 = sst [smem:[#allocation12_spill]] %s857_s2 }
   0x2   :  { %9 = sst [smem:[#allocation2]] %s858_s3 }
   0x3   :  { %10 = vsyncpa [#allocation4], 0 }
   0x4   :  { %12 = vsyncpa [#allocation4 + $0x1], 0 }
   0x5   :  { %13 = vsyncpa [#allocation6], 0 }
   0x6   :  { %14 = vsyncpa [#allocation5], 0 }
   0x7   :  { %16 = vsyncpa [#allocation5 + $0x1], 0  ;;  %s682_s17 = smov 0   ;;  %s684_s18 = smov 0  }
   0x8   :  { %s686_s19 = smov 0   ;;  %s688_s20 = smov 0  }
   0x9   :  { %s690_s21 = smov 0   ;;  %s692_s22 = smov 0  }
   0xa LB: > { %s420_s3 = sadd.s32 4294967295, %s647_s22   ;;  %s421_s23 = sadd.s32 4294967294, %s647_s22   ;;  %s647_s22 = sphi %s692_s22, %s22_s22   ;;  %s643_s21 = sphi %s690_s21, %s879_s21   ;;  %s639_s20 = sphi %s688_s20, %s878_s20   ;;  %s635_s19 = sphi %s686_s19, %s877_s19   ;;  %s631_s18 = sphi %s684_s18, %s876_s18   ;;  %s627_s17 = sphi %s682_s17, %s875_s17  }
   0xb   : > { %s43_s24 = sadd.s32 1, %s635_s19  ;;  %p50_p0 = scmp.ne.s32.totalorder %s635_s19, %s631_s18 }
   0xc   : > { %p51_p1 = scmp.eq.s32.totalorder %s647_s22, 0  ;;  %p56_p2 = scmp.ne.s32.totalorder %s631_s18, %s627_s17 }
   0xd   : > { %p720_p3 = scmp.eq.s32.totalorder %s420_s3, 0  ;;  %p150_p4 = scmp.eq.s32.totalorder %s420_s3, 1 }
   0xe   : > { %p724_p5 = por %p51_p1, %p50_p0  ;;  %p156_p6 = scmp.eq.s32.totalorder %s421_s23, 1 }
   0xf   : > { %p730_p7 = por %p720_p3, %p56_p2  ;;  %p734_p8 = por %p150_p4, %p50_p0 }
  0x10   : > { %p738_p9 = por %p156_p6, %p56_p2  ;;  %p422_p10 = scmp.ge.s32.totalorder %s647_s22, 1 }
  0x11   : > { %s865_s28 = scalar_select %p734_p8, 1, 0 }
  0x12   : > { %s866_s29 = scalar_select %p738_p9, 1, 0 }
  0x13   : > { %p163_p11 = scmp.lt.s32.totalorder %s647_s22, 3  ;;  %s867_s2 = sld [smem:[#allocation12_spill]] }
  0x14   : > { %p466_p0 = scmp.lt.s32.totalorder %s647_s22, 2  ;;  %s31_s10 = sadd.s32 1, %s643_s21 }
  0x15   : > { %p747_p12 = pnand %p422_p10, %p163_p11  ;;  %p768_p6 = scmp.ge.s32.totalorder %s31_s10, 2 }
  0x16   : > { %p757_p2 = pnand %p466_p0, %p724_p5  ;;  %s197_s12 = sand.u32 1, %s635_s19  }
  0x17   : > { %p453_p1 = pneg %p747_p12 }
  0x19   : > { %s183_s6 = sshll.u32 %s867_s2, 4  ;;  %p763_p4 = pnand %p453_p1, %p720_p3  ;;  %s184_s6 = int_to_ptr.vmem [resolvable:$true] %s183_s6 }
  0x1a   : > { %s520_s13 = scalar_lea.vmem %s184_s6, 16  ;;  %p528_p13 = scmp.lt.s32.totalorder %s184_s6, %s184_s6 }
  0x1b   : > { %p521_p10 = scmp.ne.s32.totalorder %s184_s6, %s520_s13  ;;  %p522_p11 = pneg %p763_p4 }
  0x1c   : > { %p529_p9 = scmp.lt.s32.totalorder %s520_s13, %s520_s13 }
  0x1d   : > { %p523_p5 = pnand %p522_p11, %p521_p10 }
  0x1e   : > { %p530_p8 = por %p529_p9, %p528_p13 }
  0x1f   : > { %p524_p0 = pneg %p523_p5 }
  0x21   : > { %p531_p1 = pnand %p530_p8, %p524_p0 }
  0x23   : > { %534 = shalt.err (!%p531_p1)
}
  0x24   : > { %s649_s14 = smov [#allocation7]   ;;  %s881_s10 = smov (%p768_p6, %s31_s10), 0 }
  0x25   : > { %456 = dma.vmem_to_smem (!%p763_p4), %s184_s6, 16, %s649_s14, [#allocation6]  }
  0x26   : > { %s426_s15 = sshll.u32 %s197_s12, 3  ;;  %s38_s16 = ssub.s32 %s643_s21, %s881_s10 }
  0x27   : > { %p41_p10 = scmp.eq.s32.totalorder %s38_s16, 0  ;;  %s444_s3 = sshll.u32 %s643_s21, 7 }
  0x28   : > { %s208_s30 = scalar_lea.hbm %s855_s0, %s444_s3  ;;  %s201_s5 = scalar_lea.vmem [#allocation3], %s426_s15 }
  0x29   : > { %s209_s9 = sshll.u32 %s201_s5, 4  ;;  %s198_s2 = scalar_lea.sflag [#allocation4], %s197_s12  ;;  %s210_s9 = int_to_ptr.vmem [resolvable:$true] %s209_s9 }
  0x2a   : > { %s790_s13 = scalar_select %p41_p10, %s635_s19, %s43_s24  }
  0x2b   : > { %p537_p8 = pneg %p757_p2  ;;  %s548_s6 = scalar_lea.vmem %s210_s9, 128 }
  0x2c   : > { %p549_p9 = scmp.ne.s32.totalorder %s210_s9, %s548_s6  ;;  %s650_s11 = smov [#allocation3]  }
  0x2d   : > { %s553_s14 = sshll.u32 %s650_s11, 4  ;;  %s554_s14 = int_to_ptr.vmem [resolvable:$false] %s553_s14 }
  0x2e   : > { %p551_p13 = pnand %p549_p9, %p537_p8  ;;  %s555_s16 = scalar_lea.vmem %s554_s14, 256 }
  0x2f   : > { %p556_p6 = scmp.lt.s32.totalorder %s210_s9, %s554_s14  ;;  %p557_p11 = scmp.lt.s32.totalorder %s555_s16, %s548_s6 }
  0x30   : > { %p552_p4 = pneg %p551_p13 }
  0x31   : > { %p558_p5 = por %p557_p11, %p556_p6 }
  0x33   : > { %p559_p0 = pnand %p558_p5, %p552_p4 }
  0x35   : > { %562 = shalt.err (!%p559_p0)
}
  0x36   : > { %s651_s15 = smov 32   ;;  %s652_s24 = smov 2  }
  0x37   : > { %460 = dma.hbm_to_vmem [thread:$0]  (!%p757_p2), %s208_s30, 128, %s210_s9, %s198_s2, %s651_s15, %s651_s15, %s652_s24  }
  0x38   : > { %221 = sbr.rel (%p747_p12) target bundleno = 100 (0x64), region = 36  ;;  %s799_s12 = sand.u32 (!%p747_p12), 1, %s631_s18  }
  0x39   : > { %s430_s3 = sshll.u32 (!%p747_p12), %s799_s12, 3  ;;  %s224_s23 = scalar_lea.sflag (!%p747_p12), [#allocation4], %s799_s12 }
  0x3a   : > { %s227_s26 = scalar_lea.vmem (!%p747_p12), [#allocation3], %s430_s3 }
  0x3d   : > { %614 = dma.done.wait (%p730_p7), %s224_s23, 128  }
  0x3e   : > { %616 = vsyncadd (%p730_p7), %s224_s23, 4294967168 }
  0x3f   : > { %618 = dma.done.wait (%p720_p3), [#allocation6], 16  }
  0x40   : > { %620 = vsyncadd (%p720_p3), [#allocation6], 4294967280 }
  0x41   : > { %236 = sfence }
  0x42   : > { %s273_s2 = sld [smem:[#allocation7]]  ;;  %v265_v0 = vld [vmem:[%s227_s26] sm:$0x3]  ;;  %v433_v1 = vld [vmem:[%s227_s26 + $0x2] sm:$0x3]  ;;  %s432_s25 = sshll.u32 %s799_s12, 1 }
  0x43   : > { %s276_s7 = sld [smem:[#allocation2]]  ;;  %v434_v3 = vld [vmem:[%s227_s26 + $0x4] sm:$0x3]  ;;  %v435_v6 = vld [vmem:[%s227_s26 + $0x6] sm:$0x3]  ;;  %s260_s11 = scalar_lea.vmem [#allocation8], %s432_s25 }
  0x44   : > { %s436_s8 = sld [smem:[#allocation7 + $0x1]]  ;;  %v272_v11 = vld [vmem:[%s856_s1] sm:$0x3]  ;;  %s312_s14 = sshll.u32 %s260_s11, 4  ;;  %s313_s14 = int_to_ptr.vmem [resolvable:$true] %s312_s14 }
  0x45   : > { %s437_s30 = sld [smem:[#allocation7 + $0x2]]  ;;  %s441_s16 = sshll.u32 %s639_s20, 5 }
  0x46   : > { %s438_s5 = sld [smem:[#allocation7 + $0x3]]  ;;  %s310_s3 = scalar_lea.hbm %s859_s4, %s441_s16 }
  0x47   : > { %s439_s9 = sld [smem:[#allocation7 + $0x4]]  ;;  %s298_s23 = scalar_lea.sflag [#allocation5], %s799_s12 }
  0x48   : > { %v274_v2 = vstv %s273_s2  ;;  %s563_s26 = scalar_lea.vmem %s313_s14, 32  ;;  %p872_p7 = scmp.ne.s32.totalorder %s865_s28, 0 }
  0x49   : > { %v275_v4 = vmul.f32 %v274_v2, %v265_v0  ;;  %v277_v5 = vstv %s276_s7  ;;  %p564_p3 = scmp.ne.s32.totalorder %s313_s14, %s563_s26  ;;  %s653_s2 = smov [#allocation8]  }
  0x4a   : > { %v280_v7 = vstv %s436_s8  ;;  %s567_s7 = sshll.u32 %s653_s2, 4  ;;  %s568_s7 = int_to_ptr.vmem [resolvable:$false] %s567_s7 }
  0x4b   : > { %v278_v8 = vadd.f32 %v277_v5, %v275_v4  ;;  %v281_v9 = vmul.f32 %v433_v1, %v280_v7  ;;  %v284_v10 = vstv %s437_s30  ;;  %p565_p12 = pnand %p564_p3, %p872_p7  ;;  %s569_s8 = scalar_lea.vmem %s568_s7, 64 }
  0x4c   : > { %v285_v12 = vmul.f32 %v434_v3, %v284_v10  ;;  %v288_v13 = vstv %s438_s5  ;;  %p570_p1 = scmp.lt.s32.totalorder %s313_s14, %s568_s7  ;;  %p571_p10 = scmp.lt.s32.totalorder %s569_s8, %s563_s26 }
  0x4d   : > { %v282_v14 = vadd.f32 %v281_v9, %v278_v8  ;;  %v289_v15 = vmul.f32 %v435_v6, %v288_v13  ;;  %v292_v16 = vstv %s439_s9  ;;  %p566_p2 = pneg %p565_p12 }
  0x4e   : > { %v293_v18 = vmul.f32 %v292_v16, %v272_v11  ;;  %p572_p8 = por %p571_p10, %p570_p1 }
  0x4f   : > { %v286_v17 = vadd.f32 %v285_v12, %v282_v14 }
  0x50   : > { %p573_p9 = pnand %p572_p8, %p566_p2 }
  0x51   : > { %v290_v19 = vadd.f32 %v289_v15, %v286_v17 }
  0x53   : > { %v294_v20 = vadd.f32 %v293_v18, %v290_v19 }
  0x55   : > { %v295_v21 = vmax.f32 %v294_v20, 0.0 }
  0x57   : > { %296 = vst [vmem:[%s260_s11] sm:$0x3] %v295_v21 }
  0x58   : > { %576 = shalt.err (!%p573_p9)
}
  0x59   : > { %s577_s20 = scalar_lea.hbm %s310_s3, 32  ;;  %s581_s5 = scalar_lea.hbm %s859_s4, 64 }
  0x5a   : > { %p578_p13 = scmp.ne.s32.totalorder %s310_s3, %s577_s20  ;;  %p582_p11 = scmp.lt.s32.totalorder %s310_s3, %s859_s4 }
  0x5b   : > { %p583_p5 = scmp.lt.s32.totalorder %s581_s5, %s577_s20 }
  0x5c   : > { %p579_p4 = pnand %p578_p13, %p872_p7 }
  0x5d   : > { %p584_p0 = por %p583_p5, %p582_p11 }
  0x5e   : > { %p580_p6 = pneg %p579_p4 }
  0x60   : > { %p585_p3 = pnand %p584_p0, %p580_p6 }
  0x62   : > { %588 = shalt.err (!%p585_p3)
}
  0x63   : > { %451 = dma.vmem_to_hbm [thread:$0]  (%p872_p7), %s313_s14, 32, %s310_s3, %s298_s23  }
  0x64 PF: > { %s324_s27 = sand.u32 1, %s627_s17   ;;  %p873_p12 = scmp.ne.s32.totalorder %s866_s29, 0 }
  0x65   : > { %p874_p2 = scmp.ge.s32.totalorder %s647_s22, 2  ;;  %s325_s6 = scalar_lea.sflag [#allocation5], %s324_s27 }
  0x67   : > { %p462_p1 = pnand %p874_p2, %p873_p12 }
  0x69   : > { %p463_p10 = pneg %p462_p1 }
  0x6b   : > { %622 = dma.done.wait (%p463_p10), %s325_s6, 32  }
  0x6c   : > { %624 = vsyncadd (%p463_p10), %s325_s6, 4294967264  ;;  %s22_s22 = sadd.s32 1, %s647_s22   ;;  %s875_s17 = smov %s631_s18 }
  0x6d   : > { %p19_p8 = scmp.ge.s32.totalorder %s22_s22, 4   ;;  %s876_s18 = smov %s635_s19 }
  0x6e   : > { %s877_s19 = smov %s790_s13  ;;  %s878_s20 = smov %s643_s21 }
  0x6f   : > { %s879_s21 = smov %s881_s10  ;;  %21 = sbr.rel (!%p19_p8) target bundleno = 10 (0xa), region = 92 }
  0x74   :  { %330 = vsyncpa [#allocation4], 1 }
  0x75   :  { %332 = vsyncpa [#allocation4 + $0x1], 1 }
  0x76   :  { %333 = vsyncpa [#allocation5], 1 }
  0x77   :  { %335 = vsyncpa [#allocation5 + $0x1], 1 }
  0x78   :  { %336 = vsyncpa [#allocation6], 1 }
  0x79   :  { %338 = vsyncpa [#allocation6 + $0x1], 1 }

</bundles_post_ra>
